<compile_context>
chip_gen: v5e
topology: v5e:2x2
jax: 0.10.0
libtpu: 0.0.40
codegen_flags: <defaults>
</compile_context>

<pallas_src>
import jax
import jax.numpy as jnp
from jax.experimental import pallas as pl
from jax.experimental.pallas import tpu as pltpu

LANE = 128            # lane-dense output width -> unmasked stores
SUBLANE = 16          # bf16 sublane packing: keep batch tiles a multiple of 16
DEFAULT_TILE_B = 1024 # bf16 (1024, 128) tile = 256 KiB; far under scoped VMEM on all gens


def _round_up(v, m):
    return (v + m - 1) // m * m


def _choose_batch_tiling(B, tile_b):
    """Balanced batch split: no whole-tile padding; >=2 grid steps when B >= 16 (v7x megacore)."""
    cap = tile_b
    if B >= 16:
        cap = min(cap, _round_up(pl.cdiv(B, 2), SUBLANE))
    cap = max(cap, SUBLANE)
    n_tiles = max(1, pl.cdiv(B, cap))
    tile = _round_up(pl.cdiv(B, n_tiles), SUBLANE)
    b_pad = n_tiles * tile
    return tile, b_pad, n_tiles


def _mlp_kernel(x_ref,
                w1_ref, b1_ref, w2_ref, b2_ref, w3_ref, b3_ref,
                w4_ref, b4_ref, w5_ref, b5_ref, w6_ref, b6_ref,
                o_ref):
    """One batch tile through all six layers; bf16 operands, f32 MXU accumulation."""

    def layer(h, w_ref, b_ref, relu=True):
        y = jnp.dot(h, w_ref[...], preferred_element_type=jnp.float32)
        y = y + b_ref[...]                         # f32 bias add
        if relu:
            y = jnp.maximum(y, 0.0).astype(jnp.bfloat16)  # keep inter-layer act in bf16
        return y

    h = x_ref[...]                                 # (TILE_B, in_size) bf16
    h = layer(h, w1_ref, b1_ref)                   # encoder: in -> 128, ReLU
    h = layer(h, w2_ref, b2_ref)                   # 128 -> 64, ReLU
    h = layer(h, w3_ref, b3_ref)                   # 64  -> 32, ReLU
    h = layer(h, w4_ref, b4_ref)                   # decoder: 32 -> 64, ReLU
    h = layer(h, w5_ref, b5_ref)                   # 64  -> 128, ReLU
    h = layer(h, w6_ref, b6_ref, relu=False)       # 128 -> out(pad 128), no activation (f32)
    o_ref[...] = h.astype(o_ref.dtype)             # bf16, lane-dense unmasked store


def linear_model_forward(x, params, *, tile_b=DEFAULT_TILE_B):
    """x: [B, input_size] float32. params: list of (W [in,out] f32, b [1,out] f32)."""
    B, in_size = x.shape
    out_size = params[-1][0].shape[1]
    n_layers = len(params)

    out_pad = _round_up(out_size, LANE)            # lane-dense output only
    tile_b_eff, b_pad, n_tiles = _choose_batch_tiling(B, tile_b)
    grid = (n_tiles,)

    # bf16 input slab at its true feature width; only batch rows padded (discarded later).
    x_p = jnp.zeros((b_pad, in_size), jnp.bfloat16).at[:B, :].set(x.astype(jnp.bfloat16))

    # Weights in bf16. Only the last layer's output dim is zero-padded to 128
    # (zero cols + zero bias padding -> numerically exact, sliced off in wrapper).
    padded = []
    for idx, (w, b) in enumerate(params):
        fi, fo = w.shape
        fo_p = out_pad if idx == n_layers - 1 else fo
        w_p = jnp.zeros((fi, fo_p), jnp.bfloat16).at[:, :fo].set(w.astype(jnp.bfloat16))
        b_p = jnp.zeros((1, fo_p), jnp.float32).at[:, :fo].set(b.astype(jnp.float32))
        padded.append((w_p, b_p))

    def resident_spec(shape):
        # Constant block index across the grid -> VMEM-resident; single-buffered.
        return pl.BlockSpec(shape, lambda i: (0, 0), pipeline_mode=pl.Buffered(1))

    flat_params = []
    in_specs = [pl.BlockSpec((tile_b_eff, in_size), lambda i: (i, 0))]
    for (w_p, b_p) in padded:
        flat_params.extend([w_p, b_p])
        in_specs.append(resident_spec(w_p.shape))
        in_specs.append(resident_spec(b_p.shape))

    out_specs = pl.BlockSpec((tile_b_eff, out_pad), lambda i: (i, 0))

    flops = 2 * b_pad * sum(w.size for w, _ in padded)
    bytes_accessed = (x_p.size * 2 + b_pad * out_pad * 2
                      + sum(w.size * 2 + b.size * 4 for w, b in padded))
    cost = pl.CostEstimate(flops=flops, transcendentals=0, bytes_accessed=bytes_accessed)

    out_p = pl.pallas_call(
        _mlp_kernel,
        out_shape=jax.ShapeDtypeStruct((b_pad, out_pad), jnp.bfloat16),
        grid=grid,
        in_specs=in_specs,
        out_specs=out_specs,
        compiler_params=pltpu.CompilerParams(
            dimension_semantics=("parallel",)),    # megacore sharding on v7x
        cost_estimate=cost,
    )(x_p, *flat_params)

    return out_p[:B, :out_size].astype(jnp.float32)


def init_params(key, input_size, output_size):
    """Deterministic init mirroring nn.Linear's U(-1/sqrt(fan_in), 1/sqrt(fan_in))."""
    dims = [(input_size, 128), (128, 64), (64, 32),
            (32, 64), (64, 128), (128, output_size)]
    params = []
    for (fan_in, fan_out) in dims:
        key, kw, kb = jax.random.split(key, 3)
        bound = 1.0 / jnp.sqrt(jnp.float32(fan_in))
        w = jax.random.uniform(kw, (fan_in, fan_out), jnp.float32, -bound, bound)
        b = jax.random.uniform(kb, (1, fan_out), jnp.float32, -bound, bound)
        params.append((w, b))
    return params


def reference_forward(x, params):
    """Pure-JAX reference with the same numerics policy (bf16 operands, f32 accum)."""
    h = x.astype(jnp.float32)
    for i, (w, b) in enumerate(params):
        h = jnp.dot(h.astype(jnp.bfloat16), w.astype(jnp.bfloat16),
                    preferred_element_type=jnp.float32) + b
        if i < len(params) - 1:
            h = jnp.maximum(h, 0.0)
    return h


if __name__ == "__main__":
    key = jax.random.PRNGKey(0)
    key, kx = jax.random.split(key)

    batch = 8
    input_size = 16
    output_size = 16

    x = jax.random.normal(kx, (batch, input_size), dtype=jnp.float32)
    params = init_params(key, input_size, output_size)

    out = jax.block_until_ready(linear_model_forward(x, params))
    ref = reference_forward(x, params)
    assert out.shape == (batch, output_size)
    # Tolerance slightly loosened for the bf16 output store (kernel returns f32 via wrapper upcast).
    assert jnp.allclose(out, ref, atol=2e-2, rtol=2e-2), "mismatch vs JAX reference (small batch)"

    # Exercise the multi-tile, balanced-split pipelined path (B=640 -> 2 tiles of 320, no padding).
    key, kx2 = jax.random.split(key)
    x2 = jax.random.normal(kx2, (640, input_size), dtype=jnp.float32)
    out2 = jax.block_until_ready(linear_model_forward(x2, params, tile_b=512))
    ref2 = reference_forward(x2, params)
    assert out2.shape == (640, output_size)
    assert jnp.allclose(out2, ref2, atol=2e-2, rtol=2e-2), "mismatch vs JAX reference (tiled batch)"

    print("KERNEL_OK")
</pallas_src>

<mosaic_0001>
module attributes {stable_mosaic.version = 11 : i64} {
  func.func @_mlp_kernel(%arg0: i32, %arg1: memref<16x16xbf16, #tpu.memory_space<vmem>>, %arg2: memref<16x128xbf16, #tpu.memory_space<vmem>>, %arg3: memref<1x128xf32, #tpu.memory_space<vmem>>, %arg4: memref<128x64xbf16, #tpu.memory_space<vmem>>, %arg5: memref<1x64xf32, #tpu.memory_space<vmem>>, %arg6: memref<64x32xbf16, #tpu.memory_space<vmem>>, %arg7: memref<1x32xf32, #tpu.memory_space<vmem>>, %arg8: memref<32x64xbf16, #tpu.memory_space<vmem>>, %arg9: memref<1x64xf32, #tpu.memory_space<vmem>>, %arg10: memref<64x128xbf16, #tpu.memory_space<vmem>>, %arg11: memref<1x128xf32, #tpu.memory_space<vmem>>, %arg12: memref<128x128xbf16, #tpu.memory_space<vmem>>, %arg13: memref<1x128xf32, #tpu.memory_space<vmem>>, %arg14: memref<16x128xbf16, #tpu.memory_space<vmem>>) attributes {dimension_semantics = [#tpu.dimension_semantics<parallel>], iteration_bounds = array<i64: 1>, scalar_prefetch = 0 : i64, scratch_operands = 0 : i64, tpu.core_type = #tpu.core_type<tc>, window_params = [{transform_indices = @transform_0, window_bounds = array<i64: 16, 16>}, {pipeline_mode = #tpu.pipeline_mode<synchronous>, transform_indices = @transform_1, window_bounds = array<i64: 16, 128>}, {pipeline_mode = #tpu.pipeline_mode<synchronous>, transform_indices = @transform_2, window_bounds = array<i64: 1, 128>}, {pipeline_mode = #tpu.pipeline_mode<synchronous>, transform_indices = @transform_3, window_bounds = array<i64: 128, 64>}, {pipeline_mode = #tpu.pipeline_mode<synchronous>, transform_indices = @transform_4, window_bounds = array<i64: 1, 64>}, {pipeline_mode = #tpu.pipeline_mode<synchronous>, transform_indices = @transform_5, window_bounds = array<i64: 64, 32>}, {pipeline_mode = #tpu.pipeline_mode<synchronous>, transform_indices = @transform_6, window_bounds = array<i64: 1, 32>}, {pipeline_mode = #tpu.pipeline_mode<synchronous>, transform_indices = @transform_7, window_bounds = array<i64: 32, 64>}, {pipeline_mode = #tpu.pipeline_mode<synchronous>, transform_indices = @transform_8, window_bounds = array<i64: 1, 64>}, {pipeline_mode = #tpu.pipeline_mode<synchronous>, transform_indices = @transform_9, window_bounds = array<i64: 64, 128>}, {pipeline_mode = #tpu.pipeline_mode<synchronous>, transform_indices = @transform_10, window_bounds = array<i64: 1, 128>}, {pipeline_mode = #tpu.pipeline_mode<synchronous>, transform_indices = @transform_11, window_bounds = array<i64: 128, 128>}, {pipeline_mode = #tpu.pipeline_mode<synchronous>, transform_indices = @transform_12, window_bounds = array<i64: 1, 128>}, {transform_indices = @transform_13, window_bounds = array<i64: 16, 128>}]} {
    %c0 = arith.constant 0 : index
    %c0_0 = arith.constant 0 : index
    %0 = vector.load %arg1[%c0, %c0_0] : memref<16x16xbf16, #tpu.memory_space<vmem>>, vector<16x16xbf16>
    %c0_1 = arith.constant 0 : index
    %c0_2 = arith.constant 0 : index
    %1 = vector.load %arg2[%c0_1, %c0_2] : memref<16x128xbf16, #tpu.memory_space<vmem>>, vector<16x128xbf16>
    %cst = arith.constant dense<0.000000e+00> : vector<16x128xf32>
    %2 = tpu.matmul %0, %1, %cst {dimension_numbers = #tpu.dot_dimension_numbers<[1], [0], [0], [1], [0, 0, 1, 1], [], []>} : vector<16x16xbf16>, vector<16x128xbf16>, vector<16x128xf32> -> vector<16x128xf32>
    %c0_3 = arith.constant 0 : index
    %c0_4 = arith.constant 0 : index
    %3 = vector.load %arg3[%c0_3, %c0_4] : memref<1x128xf32, #tpu.memory_space<vmem>>, vector<1x128xf32>
    %4 = vector.broadcast %3 : vector<1x128xf32> to vector<16x128xf32>
    %5 = arith.addf %2, %4 : vector<16x128xf32>
    %cst_5 = arith.constant 0.000000e+00 : f32
    %6 = vector.broadcast %cst_5 : f32 to vector<16x128xf32>
    %7 = arith.maximumf %5, %6 : vector<16x128xf32>
    %8 = arith.truncf %7 : vector<16x128xf32> to vector<16x128xbf16>
    %c0_6 = arith.constant 0 : index
    %c0_7 = arith.constant 0 : index
    %9 = vector.load %arg4[%c0_6, %c0_7] : memref<128x64xbf16, #tpu.memory_space<vmem>>, vector<128x64xbf16>
    %cst_8 = arith.constant dense<0.000000e+00> : vector<16x64xf32>
    %10 = tpu.matmul %8, %9, %cst_8 {dimension_numbers = #tpu.dot_dimension_numbers<[1], [0], [0], [1], [0, 0, 1, 1], [], []>} : vector<16x128xbf16>, vector<128x64xbf16>, vector<16x64xf32> -> vector<16x64xf32>
    %c0_9 = arith.constant 0 : index
    %c0_10 = arith.constant 0 : index
    %11 = vector.load %arg5[%c0_9, %c0_10] : memref<1x64xf32, #tpu.memory_space<vmem>>, vector<1x64xf32>
    %12 = vector.broadcast %11 : vector<1x64xf32> to vector<16x64xf32>
    %13 = arith.addf %10, %12 : vector<16x64xf32>
    %cst_11 = arith.constant 0.000000e+00 : f32
    %14 = vector.broadcast %cst_11 : f32 to vector<16x64xf32>
    %15 = arith.maximumf %13, %14 : vector<16x64xf32>
    %16 = arith.truncf %15 : vector<16x64xf32> to vector<16x64xbf16>
    %c0_12 = arith.constant 0 : index
    %c0_13 = arith.constant 0 : index
    %17 = vector.load %arg6[%c0_12, %c0_13] : memref<64x32xbf16, #tpu.memory_space<vmem>>, vector<64x32xbf16>
    %cst_14 = arith.constant dense<0.000000e+00> : vector<16x32xf32>
    %18 = tpu.matmul %16, %17, %cst_14 {dimension_numbers = #tpu.dot_dimension_numbers<[1], [0], [0], [1], [0, 0, 1, 1], [], []>} : vector<16x64xbf16>, vector<64x32xbf16>, vector<16x32xf32> -> vector<16x32xf32>
    %c0_15 = arith.constant 0 : index
    %c0_16 = arith.constant 0 : index
    %19 = vector.load %arg7[%c0_15, %c0_16] : memref<1x32xf32, #tpu.memory_space<vmem>>, vector<1x32xf32>
    %20 = vector.broadcast %19 : vector<1x32xf32> to vector<16x32xf32>
    %21 = arith.addf %18, %20 : vector<16x32xf32>
    %cst_17 = arith.constant 0.000000e+00 : f32
    %22 = vector.broadcast %cst_17 : f32 to vector<16x32xf32>
    %23 = arith.maximumf %21, %22 : vector<16x32xf32>
    %24 = arith.truncf %23 : vector<16x32xf32> to vector<16x32xbf16>
    %c0_18 = arith.constant 0 : index
    %c0_19 = arith.constant 0 : index
    %25 = vector.load %arg8[%c0_18, %c0_19] : memref<32x64xbf16, #tpu.memory_space<vmem>>, vector<32x64xbf16>
    %cst_20 = arith.constant dense<0.000000e+00> : vector<16x64xf32>
    %26 = tpu.matmul %24, %25, %cst_20 {dimension_numbers = #tpu.dot_dimension_numbers<[1], [0], [0], [1], [0, 0, 1, 1], [], []>} : vector<16x32xbf16>, vector<32x64xbf16>, vector<16x64xf32> -> vector<16x64xf32>
    %c0_21 = arith.constant 0 : index
    %c0_22 = arith.constant 0 : index
    %27 = vector.load %arg9[%c0_21, %c0_22] : memref<1x64xf32, #tpu.memory_space<vmem>>, vector<1x64xf32>
    %28 = vector.broadcast %27 : vector<1x64xf32> to vector<16x64xf32>
    %29 = arith.addf %26, %28 : vector<16x64xf32>
    %cst_23 = arith.constant 0.000000e+00 : f32
    %30 = vector.broadcast %cst_23 : f32 to vector<16x64xf32>
    %31 = arith.maximumf %29, %30 : vector<16x64xf32>
    %32 = arith.truncf %31 : vector<16x64xf32> to vector<16x64xbf16>
    %c0_24 = arith.constant 0 : index
    %c0_25 = arith.constant 0 : index
    %33 = vector.load %arg10[%c0_24, %c0_25] : memref<64x128xbf16, #tpu.memory_space<vmem>>, vector<64x128xbf16>
    %cst_26 = arith.constant dense<0.000000e+00> : vector<16x128xf32>
    %34 = tpu.matmul %32, %33, %cst_26 {dimension_numbers = #tpu.dot_dimension_numbers<[1], [0], [0], [1], [0, 0, 1, 1], [], []>} : vector<16x64xbf16>, vector<64x128xbf16>, vector<16x128xf32> -> vector<16x128xf32>
    %c0_27 = arith.constant 0 : index
    %c0_28 = arith.constant 0 : index
    %35 = vector.load %arg11[%c0_27, %c0_28] : memref<1x128xf32, #tpu.memory_space<vmem>>, vector<1x128xf32>
    %36 = vector.broadcast %35 : vector<1x128xf32> to vector<16x128xf32>
    %37 = arith.addf %34, %36 : vector<16x128xf32>
    %cst_29 = arith.constant 0.000000e+00 : f32
    %38 = vector.broadcast %cst_29 : f32 to vector<16x128xf32>
    %39 = arith.maximumf %37, %38 : vector<16x128xf32>
    %40 = arith.truncf %39 : vector<16x128xf32> to vector<16x128xbf16>
    %c0_30 = arith.constant 0 : index
    %c0_31 = arith.constant 0 : index
    %41 = vector.load %arg12[%c0_30, %c0_31] : memref<128x128xbf16, #tpu.memory_space<vmem>>, vector<128x128xbf16>
    %cst_32 = arith.constant dense<0.000000e+00> : vector<16x128xf32>
    %42 = tpu.matmul %40, %41, %cst_32 {dimension_numbers = #tpu.dot_dimension_numbers<[1], [0], [0], [1], [0, 0, 1, 1], [], []>} : vector<16x128xbf16>, vector<128x128xbf16>, vector<16x128xf32> -> vector<16x128xf32>
    %c0_33 = arith.constant 0 : index
    %c0_34 = arith.constant 0 : index
    %43 = vector.load %arg13[%c0_33, %c0_34] : memref<1x128xf32, #tpu.memory_space<vmem>>, vector<1x128xf32>
    %44 = vector.broadcast %43 : vector<1x128xf32> to vector<16x128xf32>
    %45 = arith.addf %42, %44 : vector<16x128xf32>
    %46 = arith.truncf %45 : vector<16x128xf32> to vector<16x128xbf16>
    %c0_35 = arith.constant 0 : index
    %c0_36 = arith.constant 0 : index
    %47 = vector.load %arg14[%c0_35, %c0_36] : memref<16x128xbf16, #tpu.memory_space<vmem>>, vector<16x128xbf16>
    tpu.vector_store %arg14[%c0_35, %c0_36], %46 {strides = array<i32>} : memref<16x128xbf16, #tpu.memory_space<vmem>>, vector<16x128xbf16>,
    return
  }
  func.func @transform_0(%arg0: i32) -> (i32, i32) {
    %c0_i32 = arith.constant 0 : i32
    %c0_i32_0 = arith.constant 0 : i32
    return %arg0, %c0_i32 : i32, i32
  }
  func.func @transform_1(%arg0: i32) -> (i32, i32) {
    %c0_i32 = arith.constant 0 : i32
    %c0_i32_0 = arith.constant 0 : i32
    %c0_i32_1 = arith.constant 0 : i32
    return %c0_i32, %c0_i32_0 : i32, i32
  }
  func.func @transform_2(%arg0: i32) -> (i32, i32) {
    %c0_i32 = arith.constant 0 : i32
    %c0_i32_0 = arith.constant 0 : i32
    %c0_i32_1 = arith.constant 0 : i32
    return %c0_i32, %c0_i32_0 : i32, i32
  }
  func.func @transform_3(%arg0: i32) -> (i32, i32) {
    %c0_i32 = arith.constant 0 : i32
    %c0_i32_0 = arith.constant 0 : i32
    %c0_i32_1 = arith.constant 0 : i32
    return %c0_i32, %c0_i32_0 : i32, i32
  }
  func.func @transform_4(%arg0: i32) -> (i32, i32) {
    %c0_i32 = arith.constant 0 : i32
    %c0_i32_0 = arith.constant 0 : i32
    %c0_i32_1 = arith.constant 0 : i32
    return %c0_i32, %c0_i32_0 : i32, i32
  }
  func.func @transform_5(%arg0: i32) -> (i32, i32) {
    %c0_i32 = arith.constant 0 : i32
    %c0_i32_0 = arith.constant 0 : i32
    %c0_i32_1 = arith.constant 0 : i32
    return %c0_i32, %c0_i32_0 : i32, i32
  }
  func.func @transform_6(%arg0: i32) -> (i32, i32) {
    %c0_i32 = arith.constant 0 : i32
    %c0_i32_0 = arith.constant 0 : i32
    %c0_i32_1 = arith.constant 0 : i32
    return %c0_i32, %c0_i32_0 : i32, i32
  }
  func.func @transform_7(%arg0: i32) -> (i32, i32) {
    %c0_i32 = arith.constant 0 : i32
    %c0_i32_0 = arith.constant 0 : i32
    %c0_i32_1 = arith.constant 0 : i32
    return %c0_i32, %c0_i32_0 : i32, i32
  }
  func.func @transform_8(%arg0: i32) -> (i32, i32) {
    %c0_i32 = arith.constant 0 : i32
    %c0_i32_0 = arith.constant 0 : i32
    %c0_i32_1 = arith.constant 0 : i32
    return %c0_i32, %c0_i32_0 : i32, i32
  }
  func.func @transform_9(%arg0: i32) -> (i32, i32) {
    %c0_i32 = arith.constant 0 : i32
    %c0_i32_0 = arith.constant 0 : i32
    %c0_i32_1 = arith.constant 0 : i32
    return %c0_i32, %c0_i32_0 : i32, i32
  }
  func.func @transform_10(%arg0: i32) -> (i32, i32) {
    %c0_i32 = arith.constant 0 : i32
    %c0_i32_0 = arith.constant 0 : i32
    %c0_i32_1 = arith.constant 0 : i32
    return %c0_i32, %c0_i32_0 : i32, i32
  }
  func.func @transform_11(%arg0: i32) -> (i32, i32) {
    %c0_i32 = arith.constant 0 : i32
    %c0_i32_0 = arith.constant 0 : i32
    %c0_i32_1 = arith.constant 0 : i32
    return %c0_i32, %c0_i32_0 : i32, i32
  }
  func.func @transform_12(%arg0: i32) -> (i32, i32) {
    %c0_i32 = arith.constant 0 : i32
    %c0_i32_0 = arith.constant 0 : i32
    %c0_i32_1 = arith.constant 0 : i32
    return %c0_i32, %c0_i32_0 : i32, i32
  }
  func.func @transform_13(%arg0: i32) -> (i32, i32) {
    %c0_i32 = arith.constant 0 : i32
    %c0_i32_0 = arith.constant 0 : i32
    return %arg0, %c0_i32 : i32, i32
  }
}

</mosaic_0001>

<bundles_post_ra>
// kernel: tpu_custom_call.1
= control target key start
LH: loop header
LB: loop body
LE: loop exit
PB: predicated region body
PF: predicated region fallthrough
CT: control target
= control target key end

     0   :  { %18 = vsyncpa [#allocation3], 0  ;;  %s892_s0 = inlined_call_operand.hbm [shape: bf16[16,16], index: 0, kind: input, shape index: {}]   ;;  %s893_s1 = inlined_call_operand.hbm [shape: bf16[16,128], index: 1, kind: input, shape index: {}]   ;;  %s894_s2 = inlined_call_operand.vmem [shape: f32[1,128], index: 2, kind: input, shape index: {}]   ;;  %s895_s3 = inlined_call_operand.vmem [shape: bf16[128,64], index: 3, kind: input, shape index: {}]   ;;  %s896_s4 = inlined_call_operand.vmem [shape: f32[1,64], index: 4, kind: input, shape index: {}]   ;;  %s897_s5 = inlined_call_operand.vmem [shape: bf16[64,32], index: 5, kind: input, shape index: {}]   ;;  %s898_s6 = inlined_call_operand.vmem [shape: f32[1,32], index: 6, kind: input, shape index: {}]   ;;  %s899_s7 = inlined_call_operand.vmem [shape: bf16[32,64], index: 7, kind: input, shape index: {}]   ;;  %s900_s8 = inlined_call_operand.vmem [shape: f32[1,64], index: 8, kind: input, shape index: {}]   ;;  %s901_s9 = inlined_call_operand.vmem [shape: bf16[64,128], index: 9, kind: input, shape index: {}]   ;;  %s902_s10 = inlined_call_operand.vmem [shape: f32[1,128], index: 10, kind: input, shape index: {}]   ;;  %s903_s11 = inlined_call_operand.vmem [shape: bf16[128,128], index: 11, kind: input, shape index: {}]   ;;  %s904_s12 = inlined_call_operand.vmem [shape: f32[1,128], index: 12, kind: input, shape index: {}]   ;;  %s905_s13 = inlined_call_operand.hbm [shape: bf16[16,128], index: 13, kind: output, shape index: {}]  }
   0x1   :  { %19 = vsyncpa [#allocation6], 0 }
   0x2   :  { %20 = vsyncpa [#allocation4], 0  ;;  %s25_s27 = sshll.u32 %s892_s0, 4  ;;  %s701_s28 = smov [#allocation2]   ;;  %s26_s27 = int_to_ptr.hbm [resolvable:$true] %s25_s27 }
   0x3   :  { %s27_s29 = sshll.u32 %s701_s28, 4  ;;  %s38_s15 = sshll.u32 %s893_s1, 4  ;;  %s28_s29 = int_to_ptr.vmem [resolvable:$true] %s27_s29  ;;  %s39_s15 = int_to_ptr.hbm [resolvable:$true] %s38_s15 }
   0x4   :  { %s702_s16 = smov 64   ;;  %s703_s17 = smov 4  }
   0x5   :  { %33 = dma.hbm_to_vmem [thread:$0]  %s26_s27, 128, %s28_s29, [#allocation3], %s702_s16, %s702_s16, %s703_s17  }
   0x6   :  { %s704_s18 = smov [#allocation5]  }
   0x7   :  { %s40_s19 = sshll.u32 %s704_s18, 4  ;;  %s41_s19 = int_to_ptr.vmem [resolvable:$true] %s40_s19 }
   0x8   :  { %46 = dma.hbm_to_vmem [thread:$0]  %s39_s15, 128, %s41_s19, [#allocation6], %s702_s16, %s702_s16, %s703_s17  }
   0x9   :  { %695 = dma.done.wait [#allocation3], 128  }
   0xa   :  { %696 = vsyncadd [#allocation3], 4294967168 }
   0xb   :  { %697 = dma.done.wait [#allocation6], 128  }
   0xc   :  { %698 = vsyncadd [#allocation6], 4294967168  ;;  %v580_v0 = vld [vmem:[#allocation5] sm:$0xff]  ;;  %v588_v1 = vld [vmem:[%s895_s3 + $0x38] sm:$0xff]  ;;  %vm97_vm0 = vcmask 130048   ;;  %vm239_vm1 = vcmask 523264  }
   0xd   :  { %v579_v2 = vld [vmem:[#allocation2] sm:$0xff]  ;;  %108 = vmatpush.bf16.msra.mxu0 %v580_v0  ;;  %186 = vmatpush.bf16.msra.mxu1 %v588_v1  ;;  %v587_v3 = vld [vmem:[%s895_s3 + $0x30] sm:$0xff]  ;;  %v586_v4 = vld [vmem:[%s895_s3 + $0x28] sm:$0xff]  ;;  %vm280_vm2 = vcmask 261120   ;;  %s449_s20 = sshll.u32 %s905_s13, 4  ;;  %s450_s20 = int_to_ptr.hbm [resolvable:$true] %s449_s20 }
   0xe   :  { %v585_v5 = vld [vmem:[%s895_s3 + $0x20] sm:$0xff]  ;;  %v584_v6 = vld [vmem:[%s895_s3 + $0x18] sm:$0xff]  ;;  %v583_v7 = vld [vmem:[%s895_s3 + $0x10] sm:$0xff] }
   0xf   :  { %v582_v8 = vld [vmem:[%s895_s3 + $0x8] sm:$0xff]  ;;  %v581_v9 = vld [vmem:[%s895_s3] sm:$0xff]  ;;  %v592_v18 = vld [vmem:[%s897_s5 + $0x18] sm:$0xff] }
  0x10   :  { %471 = vmatmul.msk.bf16.vlgmr.msra.gmra.mxu0 %vm97_vm0, %v579_v2  ;;  %v617_v11 = vld [vmem:[%s894_s2] ss:$0 sm:$0xff]  ;;  %247 = vmatpush.bf16.msra.mxu2 %v592_v18  ;;  %v591_v19 = vld [vmem:[%s897_s5 + $0x10] sm:$0xff]  ;;  %v590_v20 = vld [vmem:[%s897_s5 + $0x8] sm:$0xff] }
  0x11   :  { %187 = vmatpush.bf16.msra.mxu1 %v587_v3  ;;  %v589_v21 = vld [vmem:[%s897_s5] sm:$0xff]  ;;  %v594_v22 = vld [vmem:[%s899_s7 + $0x8] sm:$0xff]  ;;  %v598_v32 = vld [vmem:[%s901_s9 + $0x18] sm:$0xff] }
  0x12   :  { %v618_v24 = vld [vmem:[%s896_s4] ss:$0 sm:$0xff]  ;;  %344 = vmatpush.bf16.msrb.mxu0 %v598_v32  ;;  %v597_v41 = vld [vmem:[%s901_s9 + $0x10] sm:$0xff]  ;;  %v596_v42 = vld [vmem:[%s901_s9 + $0x8] sm:$0xff] }
  0x13   :  { %v593_v31 = vld [vmem:[%s899_s7] sm:$0xff]  ;;  %v606_v44 = vld [vmem:[%s903_s11 + $0x38] sm:$0xff]  ;;  %v605_v45 = vld [vmem:[%s903_s11 + $0x30] sm:$0xff] }
  0x14   :  { %248 = vmatpush.bf16.msra.mxu2 %v591_v19  ;;  %v619_v34 = vld [vmem:[%s898_s6] ss:$0 sm:$0xff]  ;;  %425 = vmatpush.bf16.msra.mxu3 %v606_v44  ;;  %v604_v46 = vld [vmem:[%s903_s11 + $0x28] sm:$0xff]  ;;  %v602_v56 = vld [vmem:[%s903_s11 + $0x18] sm:$0xff] }
  0x15   :  { %188 = vmatpush.bf16.msra.mxu1 %v586_v4  ;;  %v595_v43 = vld [vmem:[%s901_s9] sm:$0xff]  ;;  %v601_v57 = vld [vmem:[%s903_s11 + $0x10] sm:$0xff]  ;;  %v600_v58 = vld [vmem:[%s903_s11 + $0x8] sm:$0xff] }
  0x16   :  { %345 = vmatpush.bf16.msrb.mxu0 %v597_v41  ;;  %v603_v47 = vld [vmem:[%s903_s11 + $0x20] sm:$0xff] }
  0x17   :  { %v620_v49 = vld [vmem:[%s900_s8] ss:$0 sm:$0xff] }
  0x18   :  { %249 = vmatpush.bf16.msra.mxu2 %v590_v20  ;;  %426 = vmatpush.bf16.msra.mxu3 %v605_v45  ;;  %v599_v59 = vld [vmem:[%s903_s11] sm:$0xff]  ;;  %s705_s11 = smov [#allocation7]  }
  0x19   :  { %189 = vmatpush.bf16.msra.mxu1 %v585_v5  ;;  %v621_v61 = vld [vmem:[%s902_s10] ss:$0 sm:$0xff]  ;;  %s447_s0 = sshll.u32 %s705_s11, 4  ;;  %s448_s0 = int_to_ptr.vmem [resolvable:$true] %s447_s0 }
  0x1a   :  { %346 = vmatpush.bf16.msrb.mxu0 %v596_v42  ;;  %v622_v5 = vld [vmem:[%s904_s12] ss:$0 sm:$0xff] }
  0x1c   :  { %250 = vmatpush.bf16.msra.mxu2 %v589_v21  ;;  %427 = vmatpush.bf16.msra.mxu3 %v604_v46 }
  0x1d   :  { %190 = vmatpush.bf16.msra.mxu1 %v584_v6 }
  0x1e   :  { %347 = vmatpush.bf16.msrb.mxu0 %v595_v43 }
  0x20   :  { %290 = vmatpush.bf16.msrb.mxu2 %v594_v22  ;;  %428 = vmatpush.bf16.msra.mxu3 %v603_v47 }
  0x21   :  { %191 = vmatpush.bf16.msra.mxu1 %v583_v7 }
  0x24   :  { %291 = vmatpush.bf16.msrb.mxu2 %v593_v31  ;;  %429 = vmatpush.bf16.msra.mxu3 %v602_v56 }
  0x25   :  { %192 = vmatpush.bf16.msra.mxu1 %v582_v8 }
  0x28   :  { %430 = vmatpush.bf16.msra.mxu3 %v601_v57 }
  0x29   :  { %193 = vmatpush.bf16.msra.mxu1 %v581_v9 }
  0x2c   :  { %431 = vmatpush.bf16.msra.mxu3 %v600_v58 }
  0x30   :  { %432 = vmatpush.bf16.msra.mxu3 %v599_v59 }
  0x8d   :  { %v110_v10 = vpop.f32.mrf.mxu0 }
  0x8e   :  { %v111_v12 = vadd.f32 %v617_v11, %v110_v10 }
  0x90   :  { %v115_v15 = vmax.f32 %v111_v12, 0.0 }
  0x95   :  { %v112_v13 = vpop.f32.mrf.mxu0 }
  0x96   :  { %v113_v14 = vadd.f32 %v617_v11, %v112_v13 }
  0x98   :  { %v116_v16 = vmax.f32 %v113_v14, 0.0 }
  0x9a   :  { %v117_v17 = vpack.c.bf16 %v116_v16, %v115_v15 }
  0x9c   :  { %194 = vmatmul.bf16.vlgmr.msra.gmra.mxu1 %v117_v17 }
 0x119   :  { %v195_v23 = vpop.f32.mrf.mxu1 }
 0x11a   :  { %v196_v25 = vadd.f32 %v618_v24, %v195_v23 }
 0x11c   :  { %v200_v28 = vmax.f32 %v196_v25, 0.0 }
 0x121   :  { %v197_v26 = vpop.f32.mrf.mxu1 }
 0x122   :  { %v198_v27 = vadd.f32 %v618_v24, %v197_v26 }
 0x124   :  { %v201_v29 = vmax.f32 %v198_v27, 0.0 }
 0x126   :  { %v202_v30 = vpack.c.bf16 %v201_v29, %v200_v28 }
 0x128   :  { %520 = vmatmul.msk.bf16.vlgmr.msra.gmra.mxu2 %vm239_vm1, %v202_v30 }
 0x1ab   :  { %v252_v33 = vpop.f32.mrf.mxu2 }
 0x1ac   :  { %v253_v35 = vadd.f32 %v619_v34, %v252_v33 }
 0x1ae   :  { %v257_v38 = vmax.f32 %v253_v35, 0.0 }
 0x1b3   :  { %v254_v36 = vpop.f32.mrf.mxu2 }
 0x1b4   :  { %v255_v37 = vadd.f32 %v619_v34, %v254_v36 }
 0x1b6   :  { %v258_v39 = vmax.f32 %v255_v37, 0.0 }
 0x1b8   :  { %v259_v40 = vpack.c.bf16 %v258_v39, %v257_v38 }
 0x1ba   :  { %529 = vmatmul.msk.bf16.vlgmr.msrb.gmra.mxu2 %vm280_vm2, %v259_v40 }
 0x23d   :  { %v293_v48 = vpop.f32.mrf.mxu2 }
 0x23e   :  { %v294_v50 = vadd.f32 %v620_v49, %v293_v48 }
 0x240   :  { %v298_v53 = vmax.f32 %v294_v50, 0.0 }
 0x245   :  { %v295_v51 = vpop.f32.mrf.mxu2 }
 0x246   :  { %v296_v52 = vadd.f32 %v620_v49, %v295_v51 }
 0x248   :  { %v299_v54 = vmax.f32 %v296_v52, 0.0 }
 0x24a   :  { %v300_v55 = vpack.c.bf16 %v299_v54, %v298_v53 }
 0x24c   :  { %546 = vmatmul.msk.bf16.vlgmr.msrb.gmra.mxu0 %vm239_vm1, %v300_v55 }
 0x2c9   :  { %v349_v60 = vpop.f32.mrf.mxu0 }
 0x2ca   :  { %v350_v62 = vadd.f32 %v621_v61, %v349_v60 }
 0x2cc   :  { %v354_v1 = vmax.f32 %v350_v62, 0.0 }
 0x2d1   :  { %v351_v63 = vpop.f32.mrf.mxu0 }
 0x2d2   :  { %v352_v0 = vadd.f32 %v621_v61, %v351_v63 }
 0x2d4   :  { %v355_v2 = vmax.f32 %v352_v0, 0.0 }
 0x2d6   :  { %v356_v3 = vpack.c.bf16 %v355_v2, %v354_v1 }
 0x2d8   :  { %433 = vmatmul.bf16.vlgmr.msra.gmra.mxu3 %v356_v3 }
 0x35b   :  { %v434_v4 = vpop.f32.mrf.mxu3 }
 0x35c   :  { %v435_v7 = vadd.f32 %v622_v5, %v434_v4 }
 0x363   :  { %v436_v6 = vpop.f32.mrf.mxu3 }
 0x364   :  { %v437_v8 = vadd.f32 %v622_v5, %v436_v6 }
 0x366   :  { %v610_v9 = vpack.c.bf16 %v437_v8, %v435_v7 }
 0x368   :  { %611 = vst [vmem:[#allocation7] sm:$0xff] %v610_v9  }
 0x369   :  { %455 = dma.vmem_to_hbm [thread:$0]  %s448_s0, 128, %s450_s20, [#allocation4], %s702_s16, %s702_s16, %s703_s17  }
 0x36a   :  { %699 = dma.done.wait [#allocation4], 128  }
 0x36b   :  { %700 = vsyncadd [#allocation4], 4294967168 }
 0x36c   :  { %460 = vsyncpa [#allocation3], 1 }
 0x36d   :  { %461 = vsyncpa [#allocation6], 1 }
 0x36e   :  { %462 = vsyncpa [#allocation4], 1 }

</bundles_post_ra>
